<compile_context>
chip_gen: v7x
topology: tpu7x:2x2x1
jax: 0.10.0
libtpu: 0.0.40
codegen_flags: <defaults>
</compile_context>

<pallas_src>
import functools

import jax
import jax.numpy as jnp
from jax.experimental import pallas as pl
from jax.experimental.pallas import tpu as pltpu  # noqa: F401  (kept for TPU-specific extensions)


# ----------------------------- single fused kernel -----------------------------
def fused_model_kernel(code_ref, x_ref, a_ref, slab_ref, out_ref, *,
                       B, N, Fi, H, C, O, Fs, off):
    """Fused SAGPool-style GNN + three linear heads + log_softmax.

    code: (B,C)   x: (B*N,Fi)   a: (B*N,B*N) block-diagonal row-normalized adjacency
    slab: (R, lane) packed parameters (static offsets in `off`)
    out:  (3, B, Fs) = [log_softmax(code); log_softmax(trans); log_softmax(final)]
    """
    x = x_ref[...]        # (BN, Fi)
    a = a_ref[...]        # (BN, BN)
    code = code_ref[...]  # (B, C)

    # ---- static slices into the packed parameter slab (no concat / no extra DMA) ----
    w1 = slab_ref[off["w1"]:off["w1"] + Fi, :H]              # (Fi, H)
    w2 = slab_ref[off["w2"]:off["w2"] + H, :H]               # (H, H)
    wo_mean = slab_ref[off["wo_mean"]:off["wo_mean"] + H, :O]  # (H, O)
    wo_max = slab_ref[off["wo_max"]:off["wo_max"] + H, :O]     # (H, O)
    wc_wf = slab_ref[off["wc_wf"]:off["wc_wf"] + C, :2 * Fs]   # (C, 2Fs) = [Wc | Wf_code]
    wt_wf = slab_ref[off["wt_wf"]:off["wt_wf"] + O, :2 * Fs]   # (O, 2Fs) = [Wt | Wf_trans]
    b1 = slab_ref[off["b1"]:off["b1"] + 1, :H]                 # (1, H)
    b2 = slab_ref[off["b2"]:off["b2"] + 1, :H]                 # (1, H)
    ws = slab_ref[off["ws"]:off["ws"] + 1, :H]                 # (1, H)
    bs = slab_ref[off["bs"]:off["bs"] + 1, :1]                 # (1, 1)
    bo = slab_ref[off["bo"]:off["bo"] + 1, :O]                 # (1, O)
    bc = slab_ref[off["bc"]:off["bc"] + 1, :Fs]                # (1, Fs)
    bt = slab_ref[off["bt"]:off["bt"] + 1, :Fs]                # (1, Fs)
    bf = slab_ref[off["bf"]:off["bf"] + 1, :Fs]                # (1, Fs)

    # ---- GCN layer 1: relu((A @ X) @ W1 + b1) ----  (flat M = B*N dots)
    ax = jnp.dot(a, x, preferred_element_type=jnp.float32)                     # (BN, Fi)
    h = jnp.maximum(jnp.dot(ax, w1, preferred_element_type=jnp.float32) + b1, 0.0)  # (BN, H)

    # ---- GCN layer 2: relu((A @ H) @ W2 + b2) ----
    ah = jnp.dot(a, h, preferred_element_type=jnp.float32)                     # (BN, H)
    h2 = jnp.maximum(jnp.dot(ah, w2, preferred_element_type=jnp.float32) + b2, 0.0)  # (BN, H)

    # ---- attention score, reassociated:  s = tanh(A @ (H2 . ws) + bs) ----
    hs = jnp.sum(h2 * ws, axis=-1, keepdims=True)                              # (BN, 1)
    s = jnp.tanh(jnp.dot(a, hs, preferred_element_type=jnp.float32) + bs)      # (BN, 1)
    hg = h2 * s                                                                # (BN, H)

    # ---- global readout (per graph):  trans = mean@Wm + max@Wx + bo ----
    hg3 = hg.reshape(B, N, H)
    mean_r = jnp.mean(hg3, axis=1)                                             # (B, H)
    max_r = jnp.max(hg3, axis=1)                                               # (B, H)
    trans = (jnp.dot(mean_r, wo_mean, preferred_element_type=jnp.float32)
             + jnp.dot(max_r, wo_max, preferred_element_type=jnp.float32)
             + bo)                                                             # (B, O)

    # ---- heads: shared-LHS dots fused via pre-stacked weights ----
    code_pair = jnp.dot(code, wc_wf, preferred_element_type=jnp.float32)       # (B, 2Fs)
    trans_pair = jnp.dot(trans, wt_wf, preferred_element_type=jnp.float32)     # (B, 2Fs)
    code_logits = code_pair[:, :Fs] + bc
    trans_logits = trans_pair[:, :Fs] + bt
    final_logits = code_pair[:, Fs:] + trans_pair[:, Fs:] + bf

    def log_softmax(z):
        m = jnp.max(z, axis=-1, keepdims=True)
        zs = z - m
        return zs - jnp.log(jnp.sum(jnp.exp(zs), axis=-1, keepdims=True))

    # sublane-stacked output: no lane-axis 3-way concat
    out_ref[0] = log_softmax(code_logits)
    out_ref[1] = log_softmax(trans_logits)
    out_ref[2] = log_softmax(final_logits)


# ----------------------------- wrapper -----------------------------
def model_forward(code_x, node_x, adj, slab, offsets, dims):
    """One grid-free pallas_call: whole (tiny) batch processed in a single invocation.

    Note (v7x): a fully-fused single-step kernel uses one TensorCore; at these sizes
    launch/DMA overhead dominates, so fusion wins over splitting across cores.  If B
    is scaled up (>= ~16), add a leading batch grid with dimension_semantics=("parallel",).
    """
    B, N, Fi = node_x.shape
    H, C, O, Fs = dims["H"], dims["C"], dims["O"], dims["Fs"]

    # Plain-JAX glue: flatten nodes and build the block-diagonal adjacency once.
    x_flat = node_x.reshape(B * N, Fi)
    a_blk = (jnp.eye(B, dtype=adj.dtype)[:, None, :, None]
             * adj[:, :, None, :]).reshape(B * N, B * N)

    kernel = functools.partial(fused_model_kernel,
                               B=B, N=N, Fi=Fi, H=H, C=C, O=O, Fs=Fs, off=offsets)
    out = pl.pallas_call(
        kernel,
        out_shape=jax.ShapeDtypeStruct((3, B, Fs), jnp.float32),
    )(code_x, x_flat, a_blk, slab)
    return out[0], out[1], out[2]


# ----------------------------- pure-JAX reference (same math) -----------------------------
def model_reference(code_x, node_x, adj, p):
    ax = jnp.einsum('bij,bjf->bif', adj, node_x)
    h = jnp.maximum(jnp.einsum('bnf,fh->bnh', ax, p["w1"]) + p["b1"][None], 0.0)
    ah = jnp.einsum('bij,bjh->bih', adj, h)
    h2 = jnp.maximum(jnp.einsum('bnh,hk->bnk', ah, p["w2"]) + p["b2"][None], 0.0)
    hs = jnp.sum(h2 * p["ws"][None], axis=-1, keepdims=True)
    s = jnp.tanh(jnp.einsum('bij,bjk->bik', adj, hs) + p["bs"][None])
    hg = h2 * s
    readout = jnp.concatenate([hg.mean(axis=1), hg.max(axis=1)], axis=-1)
    trans = readout @ p["wo"] + p["bo"]
    code_prob = jax.nn.log_softmax(code_x @ p["wc"] + p["bc"], axis=-1)
    trans_prob = jax.nn.log_softmax(trans @ p["wt"] + p["bt"], axis=-1)
    final_prob = jax.nn.log_softmax(
        jnp.concatenate([code_x, trans], axis=-1) @ p["wf"] + p["bf"], axis=-1)
    return code_prob, trans_prob, final_prob


# ----------------------------- params & packing -----------------------------
def init_params(key, trans_input_size, trans_hidden, code_input_size,
                output_size, final_size):
    ks = jax.random.split(key, 14)

    def w(k, shape, scale=0.1):
        return (scale * jax.random.normal(k, shape)).astype(jnp.float32)

    H = trans_hidden
    return dict(
        w1=w(ks[0], (trans_input_size, H)),
        b1=w(ks[1], (1, H)),
        w2=w(ks[2], (H, H)),
        b2=w(ks[3], (1, H)),
        ws=w(ks[4], (1, H)),                         # attention-score vector (row layout)
        bs=w(ks[5], (1, 1)),
        wo=w(ks[6], (2 * H, output_size)),           # readout proj over [mean || max]
        bo=w(ks[7], (1, output_size)),
        wc=w(ks[8], (code_input_size, final_size)),
        bc=w(ks[9], (1, final_size)),
        wt=w(ks[10], (output_size, final_size)),
        bt=w(ks[11], (1, final_size)),
        wf=w(ks[12], (code_input_size + output_size, final_size)),
        bf=w(ks[13], (1, final_size)),
    )


def pack_params(p, trans_hidden, code_input_size, output_size, final_size):
    """Pack all parameters into one lane-padded f32 slab + static row offsets.

    Split wo -> (wo_mean, wo_max), wf -> (wf_code, wf_trans), then stack the
    shared-LHS head weights: [Wc | Wf_code] and [Wt | Wf_trans].  All row
    offsets of weight blocks are multiples of 8 (sublane-tile aligned).
    """
    H, C, O, Fs = trans_hidden, code_input_size, output_size, final_size

    wo_mean = p["wo"][:H]           # (H, O)
    wo_max = p["wo"][H:]            # (H, O)
    wf_code = p["wf"][:C]           # (C, Fs)
    wf_trans = p["wf"][C:]          # (O, Fs)
    wc_wf = jnp.concatenate([p["wc"], wf_code], axis=1)     # (C, 2Fs)
    wt_wf = jnp.concatenate([p["wt"], wf_trans], axis=1)    # (O, 2Fs)

    weight_blocks = [
        ("w1", p["w1"]), ("w2", p["w2"]),
        ("wo_mean", wo_mean), ("wo_max", wo_max),
        ("wc_wf", wc_wf), ("wt_wf", wt_wf),
    ]
    bias_rows = [
        ("b1", p["b1"]), ("b2", p["b2"]), ("ws", p["ws"]), ("bs", p["bs"]),
        ("bo", p["bo"]), ("bc", p["bc"]), ("bt", p["bt"]), ("bf", p["bf"]),
    ]

    lane = max([a.shape[1] for _, a in weight_blocks]
               + [a.shape[1] for _, a in bias_rows])

    def align8(r):
        return (r + 7) // 8 * 8

    pieces, offsets, cur = [], {}, 0
    for name, arr in weight_blocks:
        r, c = arr.shape
        blk = jnp.zeros((align8(r), lane), jnp.float32).at[:r, :c].set(arr)
        offsets[name] = cur
        pieces.append(blk)
        cur += blk.shape[0]

    nb = len(bias_rows)
    bias_blk = jnp.zeros((align8(nb), lane), jnp.float32)
    for i, (name, arr) in enumerate(bias_rows):
        bias_blk = bias_blk.at[i, :arr.shape[1]].set(arr[0])
        offsets[name] = cur + i
    pieces.append(bias_blk)
    cur += bias_blk.shape[0]

    slab = jnp.concatenate(pieces, axis=0)    # (R, lane)
    return slab, offsets


if __name__ == "__main__":
    # Small shapes consistent with the module's forward.
    B = 2                  # batch (number of graphs)
    N = 16                 # nodes per graph (dense)
    trans_input_size = 8
    trans_hidden = 16
    code_input_size = 16
    output_size = 8
    final_size = 8

    key = jax.random.PRNGKey(0)
    k_param, k_x, k_code, k_adj = jax.random.split(key, 4)

    params = init_params(k_param, trans_input_size, trans_hidden,
                         code_input_size, output_size, final_size)
    slab, offsets = pack_params(params, trans_hidden, code_input_size,
                                output_size, final_size)
    dims = dict(H=trans_hidden, C=code_input_size, O=output_size, Fs=final_size)

    node_x = jax.random.normal(k_x, (B, N, trans_input_size), dtype=jnp.float32)
    code_x = jax.random.normal(k_code, (B, code_input_size), dtype=jnp.float32)

    # Symmetric, self-looped, row-normalized dense adjacency (plain-JAX glue).
    raw = (jax.random.uniform(k_adj, (B, N, N)) > 0.7).astype(jnp.float32)
    adj = jnp.clip(raw + jnp.transpose(raw, (0, 2, 1)) + jnp.eye(N)[None], 0.0, 1.0)
    adj = adj / jnp.sum(adj, axis=-1, keepdims=True)

    code_prob, trans_prob, final_prob = model_forward(code_x, node_x, adj,
                                                      slab, offsets, dims)
    jax.block_until_ready((code_prob, trans_prob, final_prob))

    # Sanity: shapes, finiteness, and agreement with the pure-JAX reference.
    ref = model_reference(code_x, node_x, adj, params)
    for got, want in zip((code_prob, trans_prob, final_prob), ref):
        assert got.shape == (B, final_size)
        assert bool(jnp.all(jnp.isfinite(got)))
        assert bool(jnp.allclose(got, want, atol=1e-3, rtol=1e-3)), \
            float(jnp.max(jnp.abs(got - want)))

    print("KERNEL_OK")
</pallas_src>

<mosaic_0001>
module attributes {stable_mosaic.version = 11 : i64} {
  func.func @fused_model_kernel(%arg0: memref<2x16xf32, #tpu.memory_space<vmem>>, %arg1: memref<32x8xf32, #tpu.memory_space<vmem>>, %arg2: memref<32x32xf32, #tpu.memory_space<vmem>>, %arg3: memref<88x16xf32, #tpu.memory_space<vmem>>, %arg4: memref<3x2x8xf32, #tpu.memory_space<vmem>>) attributes {dimension_semantics = [], scalar_prefetch = 0 : i64, scratch_operands = 0 : i64, tpu.core_type = #tpu.core_type<tc>} {
    %c0 = arith.constant 0 : index
    %c0_0 = arith.constant 0 : index
    %0 = vector.load %arg1[%c0, %c0_0] : memref<32x8xf32, #tpu.memory_space<vmem>>, vector<32x8xf32>
    %c0_1 = arith.constant 0 : index
    %c0_2 = arith.constant 0 : index
    %1 = vector.load %arg2[%c0_1, %c0_2] : memref<32x32xf32, #tpu.memory_space<vmem>>, vector<32x32xf32>
    %c0_3 = arith.constant 0 : index
    %c0_4 = arith.constant 0 : index
    %2 = vector.load %arg0[%c0_3, %c0_4] : memref<2x16xf32, #tpu.memory_space<vmem>>, vector<2x16xf32>
    %c0_5 = arith.constant 0 : index
    %c0_6 = arith.constant 0 : index
    %3 = vector.load %arg3[%c0_5, %c0_6] : memref<88x16xf32, #tpu.memory_space<vmem>>, vector<8x16xf32>
    %c8 = arith.constant 8 : index
    %c0_7 = arith.constant 0 : index
    %4 = vector.load %arg3[%c8, %c0_7] : memref<88x16xf32, #tpu.memory_space<vmem>>, vector<16x16xf32>
    %c24 = arith.constant 24 : index
    %c0_8 = arith.constant 0 : index
    %5 = vector.load %arg3[%c24, %c0_8] : memref<88x16xf32, #tpu.memory_space<vmem>>, vector<16x8xf32>
    %c40 = arith.constant 40 : index
    %c0_9 = arith.constant 0 : index
    %6 = vector.load %arg3[%c40, %c0_9] : memref<88x16xf32, #tpu.memory_space<vmem>>, vector<16x8xf32>
    %c56 = arith.constant 56 : index
    %c0_10 = arith.constant 0 : index
    %7 = vector.load %arg3[%c56, %c0_10] : memref<88x16xf32, #tpu.memory_space<vmem>>, vector<16x16xf32>
    %c72 = arith.constant 72 : index
    %c0_11 = arith.constant 0 : index
    %8 = vector.load %arg3[%c72, %c0_11] : memref<88x16xf32, #tpu.memory_space<vmem>>, vector<8x16xf32>
    %c80 = arith.constant 80 : index
    %c0_12 = arith.constant 0 : index
    %9 = vector.load %arg3[%c80, %c0_12] : memref<88x16xf32, #tpu.memory_space<vmem>>, vector<1x16xf32>
    %c81 = arith.constant 81 : index
    %c0_13 = arith.constant 0 : index
    %10 = vector.load %arg3[%c81, %c0_13] : memref<88x16xf32, #tpu.memory_space<vmem>>, vector<1x16xf32>
    %c82 = arith.constant 82 : index
    %c0_14 = arith.constant 0 : index
    %11 = vector.load %arg3[%c82, %c0_14] : memref<88x16xf32, #tpu.memory_space<vmem>>, vector<1x16xf32>
    %c83 = arith.constant 83 : index
    %c0_15 = arith.constant 0 : index
    %12 = vector.load %arg3[%c83, %c0_15] : memref<88x16xf32, #tpu.memory_space<vmem>>, vector<1x1xf32>
    %c84 = arith.constant 84 : index
    %c0_16 = arith.constant 0 : index
    %13 = vector.load %arg3[%c84, %c0_16] : memref<88x16xf32, #tpu.memory_space<vmem>>, vector<1x8xf32>
    %c85 = arith.constant 85 : index
    %c0_17 = arith.constant 0 : index
    %14 = vector.load %arg3[%c85, %c0_17] : memref<88x16xf32, #tpu.memory_space<vmem>>, vector<1x8xf32>
    %c86 = arith.constant 86 : index
    %c0_18 = arith.constant 0 : index
    %15 = vector.load %arg3[%c86, %c0_18] : memref<88x16xf32, #tpu.memory_space<vmem>>, vector<1x8xf32>
    %c87 = arith.constant 87 : index
    %c0_19 = arith.constant 0 : index
    %16 = vector.load %arg3[%c87, %c0_19] : memref<88x16xf32, #tpu.memory_space<vmem>>, vector<1x8xf32>
    %cst = arith.constant dense<0.000000e+00> : vector<32x8xf32>
    %17 = tpu.matmul %1, %0, %cst {dimension_numbers = #tpu.dot_dimension_numbers<[1], [0], [0], [1], [0, 0, 1, 1], [], []>} : vector<32x32xf32>, vector<32x8xf32>, vector<32x8xf32> -> vector<32x8xf32>
    %cst_20 = arith.constant dense<0.000000e+00> : vector<32x16xf32>
    %18 = tpu.matmul %17, %3, %cst_20 {dimension_numbers = #tpu.dot_dimension_numbers<[1], [0], [0], [1], [0, 0, 1, 1], [], []>} : vector<32x8xf32>, vector<8x16xf32>, vector<32x16xf32> -> vector<32x16xf32>
    %19 = vector.broadcast %9 : vector<1x16xf32> to vector<32x16xf32>
    %20 = arith.addf %18, %19 : vector<32x16xf32>
    %cst_21 = arith.constant 0.000000e+00 : f32
    %21 = vector.broadcast %cst_21 : f32 to vector<32x16xf32>
    %22 = arith.maximumf %20, %21 : vector<32x16xf32>
    %cst_22 = arith.constant dense<0.000000e+00> : vector<32x16xf32>
    %23 = tpu.matmul %1, %22, %cst_22 {dimension_numbers = #tpu.dot_dimension_numbers<[1], [0], [0], [1], [0, 0, 1, 1], [], []>} : vector<32x32xf32>, vector<32x16xf32>, vector<32x16xf32> -> vector<32x16xf32>
    %cst_23 = arith.constant dense<0.000000e+00> : vector<32x16xf32>
    %24 = tpu.matmul %23, %4, %cst_23 {dimension_numbers = #tpu.dot_dimension_numbers<[1], [0], [0], [1], [0, 0, 1, 1], [], []>} : vector<32x16xf32>, vector<16x16xf32>, vector<32x16xf32> -> vector<32x16xf32>
    %25 = vector.broadcast %10 : vector<1x16xf32> to vector<32x16xf32>
    %26 = arith.addf %24, %25 : vector<32x16xf32>
    %cst_24 = arith.constant 0.000000e+00 : f32
    %27 = vector.broadcast %cst_24 : f32 to vector<32x16xf32>
    %28 = arith.maximumf %26, %27 : vector<32x16xf32>
    %29 = vector.broadcast %11 : vector<1x16xf32> to vector<32x16xf32>
    %30 = arith.mulf %28, %29 : vector<32x16xf32>
    %cst_25 = arith.constant dense<0.000000e+00> : vector<32xf32>
    %31 = vector.multi_reduction <add>, %30, %cst_25 [1] : vector<32x16xf32> to vector<32xf32>
    %32 = vector.shape_cast %31 : vector<32xf32> to vector<32x1xf32>
    %cst_26 = arith.constant dense<0.000000e+00> : vector<32x1xf32>
    %33 = tpu.matmul %1, %32, %cst_26 {dimension_numbers = #tpu.dot_dimension_numbers<[1], [0], [0], [1], [0, 0, 1, 1], [], []>} : vector<32x32xf32>, vector<32x1xf32>, vector<32x1xf32> -> vector<32x1xf32>
    %34 = vector.broadcast %12 : vector<1x1xf32> to vector<32x1xf32>
    %35 = arith.addf %33, %34 : vector<32x1xf32>
    %36 = math.tanh %35 : vector<32x1xf32>
    %37 = vector.broadcast %36 : vector<32x1xf32> to vector<32x16xf32>
    %38 = arith.mulf %28, %37 : vector<32x16xf32>
    %39 = vector.shape_cast %38 : vector<32x16xf32> to vector<2x16x16xf32>
    %cst_27 = arith.constant dense<0.000000e+00> : vector<2x16xf32>
    %40 = vector.multi_reduction <add>, %39, %cst_27 [1] : vector<2x16x16xf32> to vector<2x16xf32>
    %cst_28 = arith.constant 1.600000e+01 : f32
    %41 = vector.broadcast %cst_28 : f32 to vector<2x16xf32>
    %42 = arith.divf %40, %41 : vector<2x16xf32>
    %cst_29 = arith.constant dense<0xFF800000> : vector<2x16xf32>
    %43 = vector.multi_reduction <maximumf>, %39, %cst_29 [1] : vector<2x16x16xf32> to vector<2x16xf32>
    %cst_30 = arith.constant dense<0.000000e+00> : vector<2x8xf32>
    %44 = tpu.matmul %42, %5, %cst_30 {dimension_numbers = #tpu.dot_dimension_numbers<[1], [0], [0], [1], [0, 0, 1, 1], [], []>} : vector<2x16xf32>, vector<16x8xf32>, vector<2x8xf32> -> vector<2x8xf32>
    %cst_31 = arith.constant dense<0.000000e+00> : vector<2x8xf32>
    %45 = tpu.matmul %43, %6, %cst_31 {dimension_numbers = #tpu.dot_dimension_numbers<[1], [0], [0], [1], [0, 0, 1, 1], [], []>} : vector<2x16xf32>, vector<16x8xf32>, vector<2x8xf32> -> vector<2x8xf32>
    %46 = arith.addf %44, %45 : vector<2x8xf32>
    %47 = vector.broadcast %13 : vector<1x8xf32> to vector<2x8xf32>
    %48 = arith.addf %46, %47 : vector<2x8xf32>
    %cst_32 = arith.constant dense<0.000000e+00> : vector<2x16xf32>
    %49 = tpu.matmul %2, %7, %cst_32 {dimension_numbers = #tpu.dot_dimension_numbers<[1], [0], [0], [1], [0, 0, 1, 1], [], []>} : vector<2x16xf32>, vector<16x16xf32>, vector<2x16xf32> -> vector<2x16xf32>
    %cst_33 = arith.constant dense<0.000000e+00> : vector<2x16xf32>
    %50 = tpu.matmul %48, %8, %cst_33 {dimension_numbers = #tpu.dot_dimension_numbers<[1], [0], [0], [1], [0, 0, 1, 1], [], []>} : vector<2x8xf32>, vector<8x16xf32>, vector<2x16xf32> -> vector<2x16xf32>
    %51 = vector.extract_strided_slice %49 {offsets = [0, 0], sizes = [2, 8], strides = [1, 1]} : vector<2x16xf32> to vector<2x8xf32>
    %52 = vector.broadcast %14 : vector<1x8xf32> to vector<2x8xf32>
    %53 = arith.addf %51, %52 : vector<2x8xf32>
    %54 = vector.extract_strided_slice %50 {offsets = [0, 0], sizes = [2, 8], strides = [1, 1]} : vector<2x16xf32> to vector<2x8xf32>
    %55 = vector.broadcast %15 : vector<1x8xf32> to vector<2x8xf32>
    %56 = arith.addf %54, %55 : vector<2x8xf32>
    %57 = vector.extract_strided_slice %49 {offsets = [0, 8], sizes = [2, 8], strides = [1, 1]} : vector<2x16xf32> to vector<2x8xf32>
    %58 = vector.extract_strided_slice %50 {offsets = [0, 8], sizes = [2, 8], strides = [1, 1]} : vector<2x16xf32> to vector<2x8xf32>
    %59 = arith.addf %57, %58 : vector<2x8xf32>
    %60 = vector.broadcast %16 : vector<1x8xf32> to vector<2x8xf32>
    %61 = arith.addf %59, %60 : vector<2x8xf32>
    %cst_34 = arith.constant dense<0xFF800000> : vector<2xf32>
    %62 = vector.multi_reduction <maximumf>, %53, %cst_34 [1] : vector<2x8xf32> to vector<2xf32>
    %63 = vector.shape_cast %62 : vector<2xf32> to vector<2x1xf32>
    %64 = vector.broadcast %63 : vector<2x1xf32> to vector<2x8xf32>
    %65 = arith.subf %53, %64 : vector<2x8xf32>
    %66 = math.exp %65 : vector<2x8xf32>
    %cst_35 = arith.constant dense<0.000000e+00> : vector<2xf32>
    %67 = vector.multi_reduction <add>, %66, %cst_35 [1] : vector<2x8xf32> to vector<2xf32>
    %68 = vector.shape_cast %67 : vector<2xf32> to vector<2x1xf32>
    %69 = math.log %68 : vector<2x1xf32>
    %70 = vector.broadcast %69 : vector<2x1xf32> to vector<2x8xf32>
    %71 = arith.subf %65, %70 : vector<2x8xf32>
    %c0_36 = arith.constant 0 : index
    %c0_37 = arith.constant 0 : index
    %c0_38 = arith.constant 0 : index
    %72 = vector.load %arg4[%c0_36, %c0_37, %c0_38] : memref<3x2x8xf32, #tpu.memory_space<vmem>>, vector<1x2x8xf32>
    %73 = vector.shape_cast %72 : vector<1x2x8xf32> to vector<2x8xf32>
    %74 = vector.shape_cast %71 : vector<2x8xf32> to vector<1x2x8xf32>
    tpu.vector_store %arg4[%c0_36, %c0_37, %c0_38], %74 {strides = array<i32>} : memref<3x2x8xf32, #tpu.memory_space<vmem>>, vector<1x2x8xf32>,
    %cst_39 = arith.constant dense<0xFF800000> : vector<2xf32>
    %75 = vector.multi_reduction <maximumf>, %56, %cst_39 [1] : vector<2x8xf32> to vector<2xf32>
    %76 = vector.shape_cast %75 : vector<2xf32> to vector<2x1xf32>
    %77 = vector.broadcast %76 : vector<2x1xf32> to vector<2x8xf32>
    %78 = arith.subf %56, %77 : vector<2x8xf32>
    %79 = math.exp %78 : vector<2x8xf32>
    %cst_40 = arith.constant dense<0.000000e+00> : vector<2xf32>
    %80 = vector.multi_reduction <add>, %79, %cst_40 [1] : vector<2x8xf32> to vector<2xf32>
    %81 = vector.shape_cast %80 : vector<2xf32> to vector<2x1xf32>
    %82 = math.log %81 : vector<2x1xf32>
    %83 = vector.broadcast %82 : vector<2x1xf32> to vector<2x8xf32>
    %84 = arith.subf %78, %83 : vector<2x8xf32>
    %c1 = arith.constant 1 : index
    %c0_41 = arith.constant 0 : index
    %c0_42 = arith.constant 0 : index
    %85 = vector.load %arg4[%c1, %c0_41, %c0_42] : memref<3x2x8xf32, #tpu.memory_space<vmem>>, vector<1x2x8xf32>
    %86 = vector.shape_cast %85 : vector<1x2x8xf32> to vector<2x8xf32>
    %87 = vector.shape_cast %84 : vector<2x8xf32> to vector<1x2x8xf32>
    tpu.vector_store %arg4[%c1, %c0_41, %c0_42], %87 {strides = array<i32>} : memref<3x2x8xf32, #tpu.memory_space<vmem>>, vector<1x2x8xf32>,
    %cst_43 = arith.constant dense<0xFF800000> : vector<2xf32>
    %88 = vector.multi_reduction <maximumf>, %61, %cst_43 [1] : vector<2x8xf32> to vector<2xf32>
    %89 = vector.shape_cast %88 : vector<2xf32> to vector<2x1xf32>
    %90 = vector.broadcast %89 : vector<2x1xf32> to vector<2x8xf32>
    %91 = arith.subf %61, %90 : vector<2x8xf32>
    %92 = math.exp %91 : vector<2x8xf32>
    %cst_44 = arith.constant dense<0.000000e+00> : vector<2xf32>
    %93 = vector.multi_reduction <add>, %92, %cst_44 [1] : vector<2x8xf32> to vector<2xf32>
    %94 = vector.shape_cast %93 : vector<2xf32> to vector<2x1xf32>
    %95 = math.log %94 : vector<2x1xf32>
    %96 = vector.broadcast %95 : vector<2x1xf32> to vector<2x8xf32>
    %97 = arith.subf %91, %96 : vector<2x8xf32>
    %c2 = arith.constant 2 : index
    %c0_45 = arith.constant 0 : index
    %c0_46 = arith.constant 0 : index
    %98 = vector.load %arg4[%c2, %c0_45, %c0_46] : memref<3x2x8xf32, #tpu.memory_space<vmem>>, vector<1x2x8xf32>
    %99 = vector.shape_cast %98 : vector<1x2x8xf32> to vector<2x8xf32>
    %100 = vector.shape_cast %97 : vector<2x8xf32> to vector<1x2x8xf32>
    tpu.vector_store %arg4[%c2, %c0_45, %c0_46], %100 {strides = array<i32>} : memref<3x2x8xf32, #tpu.memory_space<vmem>>, vector<1x2x8xf32>,
    return
  }
}

</mosaic_0001>

<bundles_post_ra>
// kernel: tpu_custom_call.1
= control target key start
LH: loop header
LB: loop body
LE: loop exit
PB: predicated region body
PF: predicated region fallthrough
CT: control target
= control target key end

     0   :  { %vm45_vm0 = vcmask 261120   ;;  %s1479_s0 = inlined_call_operand.vmem [shape: f32[2,16], index: 0, kind: input, shape index: {}]   ;;  %s1480_s1 = inlined_call_operand.vmem [shape: f32[32,8], index: 1, kind: input, shape index: {}]   ;;  %s1481_s2 = inlined_call_operand.vmem [shape: f32[32,32], index: 2, kind: input, shape index: {}]   ;;  %s1482_s3 = inlined_call_operand.vmem [shape: f32[88,16], index: 3, kind: input, shape index: {}]   ;;  %s1483_s4 = inlined_call_operand.hbm [shape: f32[3,2,8], index: 4, kind: output, shape index: {}]  }
   0x1   :  { %v18_v0 = vld [vmem:[%s1480_s1] sm:$0xff]  ;;  %v19_v1 = vld [vmem:[%s1480_s1 + $0x8] sm:$0xff]  ;;  %v20_v2 = vld [vmem:[%s1480_s1 + $0x10] sm:$0xff] }
   0x2   :  { %v1169_v3 = vpack.c.bf16 %v19_v1, %v18_v0  ;;  %v21_v4 = vld [vmem:[%s1480_s1 + $0x18] sm:$0xff]  ;;  %v22_v5 = vld [vmem:[%s1481_s2] sm:$0xff] }
   0x3   :  { %v1173_v6 = vpack.c.bf16 %v21_v4, %v20_v2  ;;  %1091 = vmatprep.mubr.msk.f32.mxu0 %vm45_vm0, %v22_v5 }
   0x4   :  { %9 = vsyncpa [#allocation3], 0  ;;  %1170 = vmatprep.subr.bf16.mxu0 %v1169_v3  ;;  %v1314_v7 = vld [vmem:[%s1481_s2 + $0x8] sm:$0xff]  ;;  %v1319_v8 = vld [vmem:[%s1481_s2 + $0x10] sm:$0xff]  ;;  %vm147_vm1 = vcmask 64512   ;;  %vm338_vm2 = vcmask 130048  }
   0x5   :  { %1172 = vmatpush3.bf16.msra.mxu0 %v1169_v3  ;;  %v1328_v9 = vld [vmem:[%s1481_s2 + $0x18] sm:$0xff]  ;;  %v27_v10 = vld [vmem:[%s1482_s3] sm:$0xff]  ;;  %v28_v15 = vld [vmem:[%s1482_s3 + $0x8] sm:$0xff]  ;;  %v1261_v1 = vmov 0   ;;  %vm1263_vm3 = vmmov 0   ;;  %vm618_vm4 = vcmask 1041409  }
   0x6   :  { %1174 = vmatprep.subr.bf16.mxu0 %v1173_v6  ;;  %1097 = vmatprep.subr.mxu1 %v27_v10  ;;  %v29_v16 = vld [vmem:[%s1482_s3 + $0x10] sm:$0xff]  ;;  %s1265_s7 = smov 8   ;;  %vm966_vm5 = vcmask 123968   ;;  %vm938_vm6 = vcmask 58368   ;;  %s1266_s11 = smov 120  }
   0x7   :  { %1098 = vmatpush3.msra.mxu1 %v27_v10  ;;  %v1185_v17 = vpack.c.bf16 %v29_v16, %v28_v15  ;;  %v1009_v18 = vld [vmem:[%s1482_s3 + $0x50] ss:$0 sm:$0xff]  ;;  %v1018_v37 = vld [vmem:[%s1482_s3 + $0x51] ss:$0 sm:$0xff]  ;;  %v1023_v42 = vld [vmem:[%s1482_s3 + $0x52] ss:$0 sm:$0xff]  ;;  %1216 = vset.pattern.permute.xlu1 %v1261_v1 }
   0x8   :  { %1215 = vset.pattern.permute.xlu0 %v1261_v1  ;;  %v1024_v2 = vld [vmem:[%s1482_s3 + $0x53] ss:$0 sm:$0xff]  ;;  %v32_v15 = vld [vmem:[%s1482_s3 + $0x28] sm:$0xff] }
   0x9   :  { %1176 = vmatpush3.bf16.msra.mxu0 %v1173_v6  ;;  %v33_v16 = vld [vmem:[%s1482_s3 + $0x30] sm:$0xff] }
   0xa   :  { %1186 = vmatprep.subr.bf16.mxu0 %v1185_v17 }
   0xc   :  { %1092 = vmatmul.mubr.msk.f32.vlgmr.msra.gmra.mrb[0].mxu0 %vm45_vm0, %v1314_v7 }
   0xd   :  { %1094 = vmatprep.mubr.msk.f32.mxu0 %vm45_vm0, %v1319_v8  ;;  %1188 = vmatpush3.bf16.msra.mxu0 %v1185_v17  ;;  %v1198_v17 = vpack.c.bf16 %v33_v16, %v32_v15  ;;  %v1031_v15 = vld [vmem:[%s1482_s3 + $0x54] ss:$0 sm:$0xff] }
  0x10   :  { %1095 = vmatmul.mubr.msk.f32.gmra.mrb[2].mxu0 %vm45_vm0, %v1328_v9 }
  0xdf   :  { %v1093_v11 = vpop.f32.mrb[0].mxu0 }
  0xe0   :  { %v124_v12 = vpop.f32.mrb[1].mxu0 }
  0xe1   :  { %1099 = vmatprep.mubr.msk.f32.mxu1 %vm147_vm1, %v124_v12 }
  0xe2   :  { %1100 = vmatmul.mubr.msk.f32.vlgmr.msra.gmra.mrb[0].mxu1 %vm147_vm1, %v1093_v11 }
  0xe3   :  { %v1096_v13 = vpop.f32.mrb[2].mxu0 }
  0xe4   :  { %v134_v14 = vpop.f32.mrb[3].mxu0 }
  0xe5   :  { %1102 = vmatprep.mubr.msk.f32.mxu1 %vm147_vm1, %v134_v14 }
  0xe6   :  { %1103 = vmatmul.mubr.msk.f32.gmra.mrb[2].mxu1 %vm147_vm1, %v1096_v13 }
  0xe7   :  { %1113 = vmatprep.mubr.msk.f32.mxu1 %vm45_vm0, %v22_v5 }
 0x1b5   :  { %v1101_v19 = vpop.f32.mrb[0].mxu1 }
 0x1b6   :  { %v232_v20 = vadd.f32 %v1101_v19, %v1009_v18  ;;  %v226_v21 = vpop.f32.mrb[1].mxu1  ;;  %v30_v19 = vld [vmem:[%s1482_s3 + $0x18] sm:$0xff] }
 0x1b7   :  { %v227_v22 = vadd.f32 %v1009_v18, %v226_v21 }
 0x1b8   :  { %v246_v23 = vmax.f32 %v232_v20, 0.0  ;;  %v31_v20 = vld [vmem:[%s1482_s3 + $0x20] sm:$0xff] }
 0x1b9   :  { %v245_v24 = vmax.f32 %v227_v22, 0.0  ;;  %v1104_v25 = vpop.f32.mrb[2].mxu1  ;;  %v1201_v21 = vpack.c.bf16 %v31_v20, %v30_v19  ;;  %v1264_v22 = vmov 0.0  }
 0x1ba   :  { %v242_v26 = vadd.f32 %v1104_v25, %v1009_v18  ;;  %v236_v27 = vpop.f32.mrb[3].mxu1 }
 0x1bb   :  { %v1177_v28 = vpack.c.bf16 %v246_v23, %v245_v24  ;;  %v237_v29 = vadd.f32 %v1009_v18, %v236_v27  ;;  %v1262_v18 = vmov 0.0|0.0  }
 0x1bc   :  { %v248_v30 = vmax.f32 %v242_v26, 0.0  ;;  %1197 = vmatprep.subr.bf16.mxu0 %v1262_v18 }
 0x1bd   :  { %v247_v31 = vmax.f32 %v237_v29, 0.0  ;;  %1178 = vmatprep.subr.bf16.mxu1 %v1177_v28 }
 0x1be   :  { %1180 = vmatpush3.bf16.msra.mxu1 %v1177_v28 }
 0x1bf   :  { %v1181_v32 = vpack.c.bf16 %v248_v30, %v247_v31 }
 0x1c1   :  { %1182 = vmatprep.subr.bf16.mxu1 %v1181_v32 }
 0x1c2   :  { %1184 = vmatpush3.bf16.msra.mxu1 %v1181_v32 }
 0x1c5   :  { %1114 = vmatmul.mubr.msk.f32.vlgmr.msra.gmra.mrb[4].mxu1 %vm45_vm0, %v1314_v7 }
 0x1c6   :  { %1116 = vmatprep.mubr.msk.f32.mxu1 %vm45_vm0, %v1319_v8 }
 0x1c9   :  { %1117 = vmatmul.mubr.msk.f32.gmra.mrb[6].mxu1 %vm45_vm0, %v1328_v9 }
 0x1ca   :  { %1137 = vmatprep.mubr.msk.f32.mxu1 %vm45_vm0, %v22_v5 }
 0x298   :  { %v1115_v33 = vpop.f32.mrb[4].mxu1 }
 0x299   :  { %v315_v34 = vpop.f32.mrb[5].mxu1 }
 0x29a   :  { %1123 = vmatprep.mubr.msk.f32.mxu0 %vm338_vm2, %v315_v34 }
 0x29b   :  { %1124 = vmatmul.mubr.msk.f32.vlgmr.msra.gmra.mrb[4].mxu0 %vm338_vm2, %v1115_v33 }
 0x29c   :  { %v1118_v35 = vpop.f32.mrb[6].mxu1  ;;  %1199 = vmatpush3.bf16.msra.mxu0 %v1198_v17 }
 0x29d   :  { %v325_v36 = vpop.f32.mrb[7].mxu1  ;;  %1203 = vmatprep.subr.bf16.mxu0 %v1262_v18 }
 0x29e   :  { %1126 = vmatprep.mubr.msk.f32.mxu0 %vm338_vm2, %v325_v36 }
 0x29f   :  { %1127 = vmatmul.mubr.msk.f32.gmra.mrb[6].mxu0 %vm338_vm2, %v1118_v35 }
 0x2a0   :  { %1147 = vmatprep.mubr.msk.f32.mxu0 %vm1263_vm3, %v1264_v22 }
 0x36e   :  { %v1125_v38 = vpop.f32.mrb[4].mxu0 }
 0x36f   :  { %v1363_v39 = vadd.f32 %v1125_v38, %v1018_v37  ;;  %v417_v40 = vpop.f32.mrb[5].mxu0 }
 0x370   :  { %v1365_v41 = vadd.f32 %v1018_v37, %v417_v40 }
 0x371   :  { %v437_v43 = vmax.f32 %v1363_v39, 0.0 }
 0x372   :  { %v436_v44 = vmax.f32 %v1365_v41, 0.0  ;;  %v1128_v45 = vpop.f32.mrb[6].mxu0 }
 0x373   :  { %v1372_v46 = vadd.f32 %v1128_v45, %v1018_v37  ;;  %v427_v47 = vpop.f32.mrb[7].mxu0  ;;  %v445_v53 = vmul.f32 %v1023_v42, %v437_v43 }
 0x374   :  { %v1374_v48 = vadd.f32 %v1018_v37, %v427_v47  ;;  %v444_v49 = vmul.f32 %v1023_v42, %v436_v44 }
 0x375   :  { %v439_v50 = vmax.f32 %v1372_v46, 0.0  ;;  %v451_v55 = vsel %vm338_vm2, %v445_v53, 0.0 }
 0x376   :  { %v438_v51 = vmax.f32 %v1374_v48, 0.0  ;;  %v448_v52 = vsel %vm338_vm2, %v444_v49, 0.0 }
 0x377   :  { %449 = vadd.xlane.f32.xlu0 %v448_v52  ;;  %v447_v57 = vmul.f32 %v1023_v42, %v439_v50 }
 0x378   :  { %v446_v54 = vmul.f32 %v1023_v42, %v438_v51 }
 0x379   :  { %v457_v58 = vsel %vm338_vm2, %v447_v57, 0.0 }
 0x37a   :  { %v454_v56 = vsel %vm338_vm2, %v446_v54, 0.0 }
 0x37b   :  { %452 = vadd.xlane.f32.xlu0 %v451_v55  ;;  %455 = vadd.xlane.f32.xlu1 %v454_v56 }
 0x37f   :  { %458 = vadd.xlane.f32.xlu1 %v457_v58 }
 0x404   :  { %v450_v59 = vpop.xlane.xlu0 %449 }
 0x408   :  { %v453_v60 = vpop.xlane.xlu0 %452  ;;  %v456_v61 = vpop.xlane.xlu1 %455 }
 0x409   :  { %v1189_v62 = vpack.c.bf16 %v453_v60, %v450_v59 }
 0x40b   :  { %1190 = vmatprep.subr.bf16.mxu1 %v1189_v62 }
 0x40c   :  { %1192 = vmatpush3.bf16.msra.mxu1 %v1189_v62  ;;  %v459_v63 = vpop.xlane.xlu1 %458 }
 0x40d   :  { %v1193_v0 = vpack.c.bf16 %v459_v63, %v456_v61 }
 0x40f   :  { %1194 = vmatprep.subr.bf16.mxu1 %v1193_v0 }
 0x410   :  { %1196 = vmatpush3.bf16.msra.mxu1 %v1193_v0 }
 0x411   :  { %1200 = vmatprep.subr.bf16.mxu1 %v1262_v18 }
 0x413   :  { %1138 = vmatmul.mubr.msk.f32.vlgmr.msra.gmra.mrb[8].mxu1 %vm45_vm0, %v1314_v7 }
 0x414   :  { %1140 = vmatprep.mubr.msk.f32.mxu1 %vm45_vm0, %v1319_v8  ;;  %1202 = vmatpush3.bf16.msra.mxu1 %v1201_v21 }
 0x415   :  { %1164 = vmatprep.subr.mxu1 %v1264_v22 }
 0x417   :  { %1141 = vmatmul.mubr.msk.f32.gmra.mrb[10].mxu1 %vm45_vm0, %v1328_v9 }
 0x418   :  { %1154 = vmatprep.mubr.msk.f32.mxu1 %vm1263_vm3, %v1264_v22 }
 0x4e6   :  { %v1139_v3 = vpop.f32.mrb[8].mxu1 }
 0x4e7   :  { %v536_v4 = vadd.f32 %v1139_v3, %v1024_v2  ;;  %v530_v5 = vpop.f32.mrb[9].mxu1 }
 0x4e8   :  { %v531_v6 = vadd.f32 %v1024_v2, %v530_v5 }
 0x4e9   :  { %1217 = vtanh.f32 %v536_v4 }
 0x4ea   :  { %1219 = vtanh.f32 %v531_v6  ;;  %v1142_v7 = vpop.f32.mrb[10].mxu1 }
 0x4eb   :  { %v540_v10 = vpop.f32.mrb[11].mxu1  ;;  %v546_v8 = vadd.f32 %v1142_v7, %v1024_v2  ;;  %v34_v7 = vld [vmem:[%s1482_s3 + $0x38] sm:$0xff] }
 0x4ec   :  { %v541_v11 = vadd.f32 %v1024_v2, %v540_v10  ;;  %v35_v10 = vld [vmem:[%s1482_s3 + $0x40] sm:$0xff] }
 0x4ee   :  { %1221 = vtanh.f32 %v541_v11  ;;  %v1204_v11 = vpack.c.bf16 %v35_v10, %v34_v7 }
 0x4ef   :  { %1223 = vtanh.f32 %v546_v8  ;;  %v36_v8 = vld [vmem:[%s1482_s3 + $0x48] sm:$0xff] }
 0x4f3   :  { %v1218_v9 = vpop.eup %1217 }
 0x4f4   :  { %v1220_v12 = vpop.eup %1219  ;;  %560 = vperm.xlu1 %1216, %v1218_v9   ;;  %v26_v9 = vld [vmem:[%s1479_s0] sm:$0x3] }
 0x4f5   :  { %555 = vperm.xlu0 %1215, %v1220_v12   ;;  %v1036_v12 = vld [vmem:[%s1482_s3 + $0x57] ss:$0 sm:$0xff] }
 0x4f8   :  { %v1222_v13 = vpop.eup %1221 }
 0x4f9   :  { %565 = vperm.xlu1 %1216, %v1222_v13   ;;  %v1224_v14 = vpop.eup %1223 }
 0x4fd   :  { %570 = vperm.xlu1 %1216, %v1224_v14  }
 0x501   :  { %934 = vrot.lane.b32.xlu1 %v1036_v12, %s1265_s7 }
 0x573   :  { %v561_v23 = vpop.permute.xlu1 %560 }
 0x574   :  { %v574_v24 = vmul.f32 %v561_v23, %v437_v43  ;;  %v556_v25 = vpop.permute.xlu0 %555 }
 0x575   :  { %v573_v26 = vmul.f32 %v556_v25, %v436_v44 }
 0x576   :  { %v578_v27 = vsel %vm338_vm2, %v574_v24, 0.0  ;;  %v599_v28 = vsel %vm338_vm2, %v574_v24, -inf }
 0x577   :  { %v577_v29 = vsel %vm338_vm2, %v573_v26, 0.0  ;;  %v598_v30 = vsel %vm338_vm2, %v573_v26, -inf  ;;  %v1035_v26 = vld [vmem:[%s1482_s3 + $0x56] ss:$0 sm:$0xff] }
 0x578   :  { %v579_v31 = vadd.f32 %v578_v27, %v577_v29  ;;  %v600_v32 = vmax.f32 %v598_v30, %v599_v28  ;;  %v566_v33 = vpop.permute.xlu1 %565 }
 0x579   :  { %v575_v36 = vmul.f32 %v566_v33, %v438_v51 }
 0x57a   :  { %v580_v34 = vrot.slane %v579_v31, 4  ;;  %v601_v35 = vrot.slane %v600_v32, 4 }
 0x57b   :  { %v586_v42 = vsel %vm338_vm2, %v575_v36, 0.0  ;;  %v607_v43 = vsel %vm338_vm2, %v575_v36, -inf }
 0x57c   :  { %v581_v37 = vadd.f32 %v580_v34, %v579_v31  ;;  %v602_v38 = vmax.f32 %v600_v32, %v601_v35  ;;  %v571_v39 = vpop.permute.xlu1 %570  ;;  %v1034_v35 = vld [vmem:[%s1482_s3 + $0x55] ss:$0 sm:$0xff]  ;;  %s1267_s3 = smov [#allocation2]  }
 0x57d   :  { %v576_v40 = vmul.f32 %v571_v39, %v439_v50  ;;  %s994_s14 = sshll.u32 %s1267_s3, 4  ;;  %s995_s14 = int_to_ptr.vmem [resolvable:$true] %s994_s14 }
 0x57e   :  { %v582_v41 = vrot.slane %v581_v37, 2  ;;  %v603_v47 = vrot.slane %v602_v38, 2  ;;  %s1237_s15 = scalar_lea.vmem %s995_s14, 96  ;;  %p1242_p1 = scmp.lt.s32.totalorder %s995_s14, %s995_s14 }
 0x57f   :  { %v587_v44 = vsel %vm338_vm2, %v576_v40, 0.0  ;;  %v608_v45 = vsel %vm338_vm2, %v576_v40, -inf  ;;  %p1238_p0 = scmp.ne.s32.totalorder %s995_s14, %s1237_s15  ;;  %p1243_p2 = scmp.lt.s32.totalorder %s1237_s15, %s1237_s15 }
 0x580   :  { %v588_v49 = vadd.f32 %v587_v44, %v586_v42  ;;  %v609_v52 = vmax.f32 %v607_v43, %v608_v45  ;;  %v583_v48 = vadd.f32 %v582_v41, %v581_v37  ;;  %v604_v54 = vmax.f32 %v602_v38, %v603_v47  ;;  %v935_v23 = vpop.permute.xlu1 %934 }
 0x581   :  { %p1244_p3 = por %p1243_p2, %p1242_p1 }
 0x582   :  { %v589_v51 = vrot.slane %v588_v49, 4  ;;  %v610_v53 = vrot.slane %v609_v52, 4  ;;  %v584_v46 = vrot.slane %v583_v48, 1  ;;  %v605_v58 = vrot.slane %v604_v54, 1 }
 0x583   :  { %p1245_p4 = pnand %p1244_p3, %p1238_p0 }
 0x584   :  { %v590_v55 = vadd.f32 %v589_v51, %v588_v49  ;;  %v611_v56 = vmax.f32 %v609_v52, %v610_v53  ;;  %v585_v61 = vadd.f32 %v584_v46, %v583_v48  ;;  %v606_v0 = vmax.f32 %v604_v54, %v605_v58 }
 0x586   :  { %v591_v50 = vrot.slane %v590_v55, 2  ;;  %v612_v57 = vrot.slane %v611_v56, 2  ;;  %v596_v3 = vmul.f32 0.0625, %v585_v61 }
 0x588   :  { %v592_v59 = vadd.f32 %v591_v50, %v590_v55  ;;  %v613_v60 = vmax.f32 %v611_v56, %v612_v57 }
 0x58a   :  { %v593_v62 = vrot.slane %v592_v59, 1  ;;  %v614_v63 = vrot.slane %v613_v60, 1 }
 0x58c   :  { %v594_v1 = vadd.f32 %v593_v62, %v592_v59  ;;  %v615_v2 = vmax.f32 %v613_v60, %v614_v63 }
 0x58e   :  { %v597_v4 = vmul.f32 0.0625, %v594_v1  ;;  %v619_v5 = vsel %vm618_vm4, %v615_v2, %v606_v0 }
 0x58f   :  { %1148 = vmatmul.mubr.msk.f32.vlgmr.msra.gmra.mrb[8].mxu0 %vm338_vm2, %v619_v5 }
 0x590   :  { %v694_v6 = vsel %vm618_vm4, %v597_v4, %v596_v3  ;;  %1161 = vmatprep.mubr.msk.f32.mxu0 %vm1263_vm3, %v1264_v22  ;;  %1205 = vmatpush3.bf16.msra.mxu0 %v1204_v11 }
 0x591   :  { %1155 = vmatmul.mubr.msk.f32.vlgmr.msra.gmra.mrb[12].mxu1 %vm338_vm2, %v694_v6 }
 0x592   :  { %1166 = vmatprep.mubr.msk.f32.mxu1 %vm1263_vm3, %v1264_v22  ;;  %1165 = vmatpush3.msra.mxu1 %v36_v8 }
 0x593   :  { %1162 = vmatmul.mubr.msk.f32.vlgmr.msra.gmra.mrb[10].mxu0 %vm338_vm2, %v26_v9 }
 0x662   :  { %v688_v13 = vpop.f32.mrb[8].mxu0 }
 0x663   :  { %v1149_v14 = vpop.f32.mrb[9].mxu0 }
 0x664   :  { %v763_v16 = vpop.f32.mrb[12].mxu1 }
 0x665   :  { %v764_v17 = vadd.f32 %v763_v16, %v688_v13  ;;  %v1156_v18 = vpop.f32.mrb[13].mxu1 }
 0x666   :  { %v841_v20 = vpop.f32.mrb[10].mxu0 }
 0x667   :  { %v771_v19 = vadd.f32 %v1031_v15, %v764_v17  ;;  %v1163_v21 = vpop.f32.mrb[11].mxu0  ;;  %v922_v36 = vadd.f32 %v1034_v35, %v841_v20 }
 0x669   :  { %1167 = vmatmul.mubr.msk.f32.vlgmr.msra.gmra.mrb[14].mxu1 %vm147_vm1, %v771_v19  ;;  %v939_v37 = vsel %vm938_vm6, %v922_v36, -inf }
 0x73c   :  { %v914_v22 = vpop.f32.mrb[14].mxu1 }
 0x73d   :  { %v928_v24 = vadd.f32 %v914_v22, %v841_v20  ;;  %v1168_v25 = vpop.f32.mrb[15].mxu1  ;;  %v927_v28 = vadd.f32 %v1035_v26, %v914_v22 }
 0x73f   :  { %v937_v27 = vadd.f32 %v935_v23, %v928_v24  ;;  %v952_v30 = vsel %vm938_vm6, %v927_v28, -inf }
 0x741   :  { %v967_v29 = vsel %vm966_vm5, %v937_v27, -inf }
 0x742   :  { %968 = vmax.xlane.f32.xlu1 %v967_v29 }
 0x746   :  { %953 = vmax.xlane.f32.xlu1 %v952_v30 }
 0x7cf   :  { %v969_v31 = vpop.xlane.xlu1 %968 }
 0x7d0   :  { %v970_v32 = vsub.f32 %v937_v27, %v969_v31 }
 0x7d2   :  { %v971_v33 = vmul.f32 1.442695, %v970_v32 }
 0x7d3   :  { %v954_v40 = vpop.xlane.xlu1 %953 }
 0x7d4   :  { %1225 = vpow2.f32 %v971_v33  ;;  %v955_v41 = vsub.f32 %v927_v28, %v954_v40 }
 0x7d6   :  { %v956_v44 = vmul.f32 1.442695, %v955_v41 }
 0x7de   :  { %v1226_v34 = vpop.eup %1225 }
 0x7df   :  { %974 = vrot.lane.b32.xlu0 %v1226_v34, %s1266_s11 }
 0x7fe   :  { %940 = vmax.xlane.f32.xlu0 %v939_v37 }
 0x851   :  { %v975_v38 = vpop.permute.xlu0 %974 }
 0x852   :  { %v977_v39 = vsel %vm938_vm6, %v975_v38, 0.0 }
 0x853   :  { %978 = vadd.xlane.f32.xlu1 %v977_v39 }
 0x88b   :  { %v941_v42 = vpop.xlane.xlu0 %940 }
 0x88c   :  { %v942_v43 = vsub.f32 %v922_v36, %v941_v42 }
 0x88e   :  { %v943_v45 = vmul.f32 1.442695, %v942_v43 }
 0x890   :  { %1227 = vpow2.f32 %v943_v45 }
 0x891   :  { %1229 = vpow2.f32 %v956_v44 }
 0x89a   :  { %v1228_v47 = vpop.eup %1227 }
 0x89b   :  { %v945_v49 = vsel %vm938_vm6, %v1228_v47, 0.0  ;;  %v1230_v52 = vpop.eup %1229 }
 0x89c   :  { %946 = vadd.xlane.f32.xlu1 %v945_v49  ;;  %v958_v48 = vsel %vm938_vm6, %v1230_v52, 0.0 }
 0x8a0   :  { %959 = vadd.xlane.f32.xlu1 %v958_v48 }
 0x8e0   :  { %v979_v51 = vpop.xlane.xlu1 %978 }
 0x8e1   :  { %1231 = vlog2.f32 %v979_v51 }
 0x8eb   :  { %v1232_v53 = vpop.eup %1231 }
 0x8ec   :  { %v981_v54 = vmul.f32 0.6931472, %v1232_v53 }
 0x8ee   :  { %v982_v55 = vsub.f32 %v970_v32, %v981_v54 }
 0x8f0   :  { %984 = vrot.lane.b32.xlu0 %v982_v55, %s1266_s11 }
 0x929   :  { %v947_v56 = vpop.xlane.xlu1 %946 }
 0x92a   :  { %1233 = vlog2.f32 %v947_v56 }
 0x92d   :  { %v960_v46 = vpop.xlane.xlu1 %959 }
 0x92e   :  { %1235 = vlog2.f32 %v960_v46 }
 0x934   :  { %v1234_v50 = vpop.eup %1233 }
 0x935   :  { %v949_v57 = vmul.f32 0.6931472, %v1234_v50 }
 0x937   :  { %v950_v58 = vsub.f32 %v942_v43, %v949_v57 }
 0x938   :  { %v1236_v59 = vpop.eup %1235 }
 0x939   :  { %951 = vst.msk [vmem:[#allocation2] sm:$0x3] %vm938_vm6, %v950_v58  ;;  %v962_v60 = vmul.f32 0.6931472, %v1236_v59 }
 0x93b   :  { %v963_v61 = vsub.f32 %v955_v41, %v962_v60 }
 0x93d   :  { %965 = vst.msk [vmem:[#allocation2 + $0x2] sm:$0x3] %vm938_vm6, %v963_v61 }
 0x962   :  { %v985_v62 = vpop.permute.xlu0 %984 }
 0x963   :  { %988 = vst.msk [vmem:[#allocation2 + $0x4] sm:$0x3] %vm938_vm6, %v985_v62 }
 0x964   :  { %1248 = shalt.err (!%p1245_p4)
}
 0x965   :  { %s1249_s18 = scalar_lea.hbm %s1483_s4, 96 }
 0x966   :  { %p1250_p5 = scmp.ne.s32.totalorder %s1483_s4, %s1249_s18  ;;  %p1253_p6 = scmp.lt.u32.totalorder %s1249_s18, %s1483_s4 }
 0x968   :  { %p1255_p7 = pnand %p1253_p6, %p1250_p5 }
 0x96a   :  { %1258 = shalt.err (!%p1255_p7)
}
 0x96b   :  { %s1268_s23 = smov 32   ;;  %s1269_s24 = smov 2  }
 0x96c   :  { %1000 = dma.vmem_to_hbm [thread:$0]  %s995_s14, 96, %s1483_s4, [#allocation3], %s1268_s23, %s1268_s23, %s1269_s24  }
 0x96d   :  { %1259 = dma.done.wait [#allocation3], 96  }
 0x96e   :  { %1260 = vsyncadd [#allocation3], 4294967200 }
 0x96f   :  { %1004 = vsyncpa [#allocation3], 1 }

</bundles_post_ra>
